<compile_context>
chip_gen: v7x
topology: tpu7x:2x2x1
jax: 0.10.0
libtpu: 0.0.40
codegen_flags: <defaults>
</compile_context>

<pallas_src>
import functools

import numpy as np
import jax
import jax.numpy as jnp
from jax.experimental import pallas as pl
from jax.experimental.pallas import tpu as pltpu

# ----------------------------- configuration --------------------------------
MUL0 = 8                    # multiplicity of 0e in irreps_in1 / irreps_out
MUL1 = 8                    # multiplicity of 1o in irreps_in1 / irreps_out
D_IN = MUL0 + 3 * MUL1      # 32
NS = MUL0                   # 8 scalars passed through SiLU
NG = MUL1                   # 8 gate scalars (one per gated 1o irrep)
NV = 3 * MUL1               # 24 flattened l=1 components
D_G2 = NS + NV + NV         # 56 rows: [scalars | gates replicated x3 | vectors]
D_OUT = NS + NV             # 32


def _normalize2mom_const(f):
    """e3nn normalize2mom: c s.t. E_{z~N(0,1)}[ (c*f(z))^2 ] = 1 (quadrature)."""
    z = np.linspace(-12.0, 12.0, 240001)
    dz = z[1] - z[0]
    pdf = np.exp(-0.5 * z * z) / np.sqrt(2.0 * np.pi)
    second_moment = np.sum(f(z) ** 2 * pdf) * dz
    return float(1.0 / np.sqrt(second_moment))


SILU_C = _normalize2mom_const(lambda z: z / (1.0 + np.exp(-z)))   # ~1.679
SIG_C = _normalize2mom_const(lambda z: 1.0 / (1.0 + np.exp(-z)))  # ~1.848


# ------------------------------ Pallas kernel -------------------------------
def _o3_swish_gate_kernel(x_ref, w_ref, b_ref, o_ref, *, silu_c, sig_c):
    # Transposed (batch-on-lanes) layout:
    #   x_ref : (D_IN,  bn)  input features^T  (scalars | flattened vectors)
    #   w_ref : (D_G2, D_IN) fused TP weight (scalars | gates x3 | W1 (x) I3)
    #   b_ref : (D_G2, 1)    bias column (zero on the vector rows)
    #   o_ref : (D_OUT, bn)  output^T
    x = x_ref[...]
    # Single fused "tensor product + rescale + bias + gate-repeat" matmul.
    y = jnp.dot(w_ref[...], x, preferred_element_type=jnp.float32) + b_ref[...]

    s = y[:NS, :]             # (8,  bn) scalars -> SiLU
    g = y[NS:NS + NV, :]      # (24, bn) gates (already replicated x3) -> sigmoid
    v = y[NS + NV:, :]        # (24, bn) gated l=1 features (flattened)

    # sigmoid via EUP exp + EUP approx-reciprocal (keeps VALU slots free).
    sig_s = pl.reciprocal(1.0 + jnp.exp(-s), approx=True)
    sig_g = pl.reciprocal(1.0 + jnp.exp(-g), approx=True)
    s_act = (silu_c * s) * sig_s          # normalized SiLU
    v_out = v * (sig_c * sig_g)           # gated vectors

    # Both stores are sublane-aligned (offsets 0 and 8) and full lane width,
    # i.e. unmasked vst -- equivalent to one dense full-tile store.
    o_ref[:NS, :] = s_act.astype(o_ref.dtype)
    o_ref[NS:, :] = v_out.astype(o_ref.dtype)


def o3_tensor_product_swish_gate_t(x_t, w_t, bias_col, *, block_n=1024):
    """Forward on batch-on-lanes data: x_t (D_IN, N) -> (D_OUT, N)."""
    d_in, n = x_t.shape
    assert d_in == D_IN
    # Lane-tile size: multiple of 128, no larger than needed for small N.
    bn = max(128, (min(block_n, n) // 128) * 128)
    bn = min(bn, pl.cdiv(n, 128) * 128)
    n_pad = pl.cdiv(n, bn) * bn
    if n_pad != n:
        x_t = jnp.pad(x_t, ((0, 0), (0, n_pad - n)))

    kernel = functools.partial(_o3_swish_gate_kernel, silu_c=SILU_C, sig_c=SIG_C)
    out_t = pl.pallas_call(
        kernel,
        out_shape=jax.ShapeDtypeStruct((D_OUT, n_pad), x_t.dtype),
        grid_spec=pltpu.PrefetchScalarGridSpec(
            num_scalar_prefetch=0,
            grid=(n_pad // bn,),
            in_specs=[
                pl.BlockSpec((D_IN, bn), lambda i: (0, i)),
                pl.BlockSpec((D_G2, D_IN), lambda i: (0, 0)),   # constant block
                pl.BlockSpec((D_G2, 1), lambda i: (0, 0)),      # constant block
            ],
            out_specs=pl.BlockSpec((D_OUT, bn), lambda i: (0, i)),
        ),
        compiler_params=pltpu.CompilerParams(
            dimension_semantics=("parallel",)),
    )(x_t, w_t, bias_col)
    return out_t if n_pad == n else out_t[:, :n]


def o3_tensor_product_swish_gate(x, w_t, bias_col, *, block_n=1024):
    """Row-major interface matching the PyTorch module: x (N, D_IN) -> (N, D_OUT).

    The transposes here are plain XLA ops outside the kernel; a full SEGNN
    stack should keep the transposed layout end-to-end and call
    `o3_tensor_product_swish_gate_t` directly.
    """
    out_t = o3_tensor_product_swish_gate_t(x.T, w_t, bias_col, block_n=block_n)
    return out_t.T


# -------------------------- parameter construction --------------------------
def build_params(key):
    """Deterministic init following O3TensorProduct.tensor_product_init."""
    k_w0, k_w1, k_b = jax.random.split(key, 3)
    # fan_in per output slice = mul_in1 * mul_in2 = 8 * 1
    sqrt_k = 1.0 / np.sqrt(MUL0 * 1)
    w0 = jax.random.uniform(k_w0, (MUL0, NS + NG), jnp.float32, -sqrt_k, sqrt_k)
    w1 = jax.random.uniform(k_w1, (MUL1, MUL1), jnp.float32, -sqrt_k, sqrt_k)
    bias = jax.random.uniform(k_b, (NS + NG,), jnp.float32, -sqrt_k, sqrt_k)

    # Fused transposed weight (D_G2, D_IN):
    #   rows  0: 8  scalar outputs       <- W0[:, :8]^T          on scalar inputs
    #   rows  8:32  gates replicated x3  <- kron(W0[:, 8:]^T, 1_{3x1})
    #   rows 32:56  vector outputs       <- kron(W1^T, I3)       on vector inputs
    eye3 = jnp.eye(3, dtype=jnp.float32)
    ones31 = jnp.ones((3, 1), jnp.float32)
    w_t = jnp.zeros((D_G2, D_IN), jnp.float32)
    w_t = w_t.at[:NS, :MUL0].set(w0[:, :NS].T)
    w_t = w_t.at[NS:NS + NV, :MUL0].set(jnp.kron(w0[:, NS:].T, ones31))
    w_t = w_t.at[NS + NV:, MUL0:].set(jnp.kron(w1.T, eye3))

    bias_col = jnp.concatenate([
        bias[:NS],
        jnp.repeat(bias[NS:], 3),             # gate biases replicated x3
        jnp.zeros((NV,), jnp.float32),        # no bias on l=1 rows
    ])[:, None]
    return w0, w1, bias, w_t, bias_col


def reference_forward(x, w0, w1, bias):
    """Plain-JAX reference of the exact same math (for validation)."""
    xs = x[:, :MUL0]
    xv = x[:, MUL0:].reshape(-1, MUL1, 3)
    ys = xs @ w0 + bias
    yv = jnp.einsum('nuk,uw->nwk', xv, w1)
    s_act = SILU_C * jax.nn.silu(ys[:, :NS])
    gate = SIG_C * jax.nn.sigmoid(ys[:, NS:])
    out_v = yv * gate[:, :, None]
    return jnp.concatenate([s_act, out_v.reshape(-1, NV)], axis=-1)


# ---------------------------------- main -------------------------------------
if __name__ == "__main__":
    key = jax.random.PRNGKey(0)
    k_param, k_x = jax.random.split(key)
    w0, w1, bias, w_t, bias_col = build_params(k_param)

    N = 16
    # data_in1 with irreps "8x0e + 8x1o"  (data_in2 = None -> ones of '1x0e')
    x = jax.random.normal(k_x, (N, D_IN), dtype=jnp.float32)

    out = o3_tensor_product_swish_gate(x, w_t, bias_col)
    out = jax.block_until_ready(out)

    ref = jax.block_until_ready(reference_forward(x, w0, w1, bias))
    assert out.shape == (N, D_OUT)
    assert np.allclose(np.asarray(out), np.asarray(ref), rtol=1e-2, atol=1e-2), \
        "Pallas kernel does not match reference"

    print("KERNEL_OK")
</pallas_src>

<mosaic_0001>
module attributes {stable_mosaic.version = 11 : i64} {
  func.func @_o3_swish_gate_kernel(%arg0: i32, %arg1: memref<32x128xf32, #tpu.memory_space<vmem>>, %arg2: memref<56x32xf32, #tpu.memory_space<vmem>>, %arg3: memref<56x1xf32, #tpu.memory_space<vmem>>, %arg4: memref<32x128xf32, #tpu.memory_space<vmem>>) attributes {dimension_semantics = [#tpu.dimension_semantics<parallel>], iteration_bounds = array<i64: 1>, scalar_prefetch = 0 : i64, scratch_operands = 0 : i64, tpu.core_type = #tpu.core_type<tc>, window_params = [{transform_indices = @transform_0, window_bounds = array<i64: 32, 128>}, {pipeline_mode = #tpu.pipeline_mode<synchronous>, transform_indices = @transform_1, window_bounds = array<i64: 56, 32>}, {pipeline_mode = #tpu.pipeline_mode<synchronous>, transform_indices = @transform_2, window_bounds = array<i64: 56, 1>}, {transform_indices = @transform_3, window_bounds = array<i64: 32, 128>}]} {
    %c0 = arith.constant 0 : index
    %c0_0 = arith.constant 0 : index
    %0 = vector.load %arg1[%c0, %c0_0] : memref<32x128xf32, #tpu.memory_space<vmem>>, vector<32x128xf32>
    %c0_1 = arith.constant 0 : index
    %c0_2 = arith.constant 0 : index
    %1 = vector.load %arg2[%c0_1, %c0_2] : memref<56x32xf32, #tpu.memory_space<vmem>>, vector<56x32xf32>
    %cst = arith.constant dense<0.000000e+00> : vector<56x128xf32>
    %2 = tpu.matmul %1, %0, %cst {dimension_numbers = #tpu.dot_dimension_numbers<[1], [0], [0], [1], [0, 0, 1, 1], [], []>} : vector<56x32xf32>, vector<32x128xf32>, vector<56x128xf32> -> vector<56x128xf32>
    %c0_3 = arith.constant 0 : index
    %c0_4 = arith.constant 0 : index
    %3 = vector.load %arg3[%c0_3, %c0_4] : memref<56x1xf32, #tpu.memory_space<vmem>>, vector<56x1xf32>
    %4 = vector.broadcast %3 : vector<56x1xf32> to vector<56x128xf32>
    %5 = arith.addf %2, %4 : vector<56x128xf32>
    %6 = vector.extract_strided_slice %5 {offsets = [0, 0], sizes = [8, 128], strides = [1, 1]} : vector<56x128xf32> to vector<8x128xf32>
    %7 = vector.extract_strided_slice %5 {offsets = [8, 0], sizes = [24, 128], strides = [1, 1]} : vector<56x128xf32> to vector<24x128xf32>
    %8 = vector.extract_strided_slice %5 {offsets = [32, 0], sizes = [24, 128], strides = [1, 1]} : vector<56x128xf32> to vector<24x128xf32>
    %cst_5 = arith.constant 0.000000e+00 : f32
    %9 = vector.broadcast %cst_5 : f32 to vector<8x128xf32>
    %10 = arith.subf %9, %6 : vector<8x128xf32>
    %11 = math.exp %10 : vector<8x128xf32>
    %cst_6 = arith.constant 1.000000e+00 : f32
    %12 = vector.broadcast %cst_6 : f32 to vector<8x128xf32>
    %13 = arith.addf %12, %11 : vector<8x128xf32>
    %14 = tpu.reciprocal %13 {approx = true} : vector<8x128xf32> -> vector<8x128xf32>
    %cst_7 = arith.constant 0.000000e+00 : f32
    %15 = vector.broadcast %cst_7 : f32 to vector<24x128xf32>
    %16 = arith.subf %15, %7 : vector<24x128xf32>
    %17 = math.exp %16 : vector<24x128xf32>
    %cst_8 = arith.constant 1.000000e+00 : f32
    %18 = vector.broadcast %cst_8 : f32 to vector<24x128xf32>
    %19 = arith.addf %18, %17 : vector<24x128xf32>
    %20 = tpu.reciprocal %19 {approx = true} : vector<24x128xf32> -> vector<24x128xf32>
    %cst_9 = arith.constant 1.67653251 : f32
    %21 = vector.broadcast %cst_9 : f32 to vector<8x128xf32>
    %22 = arith.mulf %21, %6 : vector<8x128xf32>
    %23 = arith.mulf %22, %14 : vector<8x128xf32>
    %cst_10 = arith.constant 1.8462286 : f32
    %24 = vector.broadcast %cst_10 : f32 to vector<24x128xf32>
    %25 = arith.mulf %24, %20 : vector<24x128xf32>
    %26 = arith.mulf %8, %25 : vector<24x128xf32>
    %c0_11 = arith.constant 0 : index
    %c0_12 = arith.constant 0 : index
    %27 = vector.load %arg4[%c0_11, %c0_12] : memref<32x128xf32, #tpu.memory_space<vmem>>, vector<8x128xf32>
    tpu.vector_store %arg4[%c0_11, %c0_12], %23 {strides = array<i32>} : memref<32x128xf32, #tpu.memory_space<vmem>>, vector<8x128xf32>,
    %c8 = arith.constant 8 : index
    %c0_13 = arith.constant 0 : index
    %28 = vector.load %arg4[%c8, %c0_13] : memref<32x128xf32, #tpu.memory_space<vmem>>, vector<24x128xf32>
    tpu.vector_store %arg4[%c8, %c0_13], %26 {strides = array<i32>} : memref<32x128xf32, #tpu.memory_space<vmem>>, vector<24x128xf32>,
    return
  }
  func.func @transform_0(%arg0: i32) -> (i32, i32) {
    %c0_i32 = arith.constant 0 : i32
    %c0_i32_0 = arith.constant 0 : i32
    return %c0_i32, %arg0 : i32, i32
  }
  func.func @transform_1(%arg0: i32) -> (i32, i32) {
    %c0_i32 = arith.constant 0 : i32
    %c0_i32_0 = arith.constant 0 : i32
    %c0_i32_1 = arith.constant 0 : i32
    return %c0_i32, %c0_i32_0 : i32, i32
  }
  func.func @transform_2(%arg0: i32) -> (i32, i32) {
    %c0_i32 = arith.constant 0 : i32
    %c0_i32_0 = arith.constant 0 : i32
    %c0_i32_1 = arith.constant 0 : i32
    return %c0_i32, %c0_i32_0 : i32, i32
  }
  func.func @transform_3(%arg0: i32) -> (i32, i32) {
    %c0_i32 = arith.constant 0 : i32
    %c0_i32_0 = arith.constant 0 : i32
    return %c0_i32, %arg0 : i32, i32
  }
}

</mosaic_0001>

<bundles_post_ra>
// kernel: tpu_custom_call.1
= control target key start
LH: loop header
LB: loop body
LE: loop exit
PB: predicated region body
PF: predicated region fallthrough
CT: control target
= control target key end

     0   :  { %v344_v3 = vmov 0.0|0.0   ;;  %vm345_vm0 = vmmov 0   ;;  %v346_v6 = vmov 0.0   ;;  %v347_v10 = vmov 0   ;;  %s451_s0 = inlined_call_operand.vmem [shape: f32[32,128], index: 0, kind: input, shape index: {}]   ;;  %s452_s1 = inlined_call_operand.vmem [shape: f32[56,32], index: 1, kind: input, shape index: {}]   ;;  %s453_s2 = inlined_call_operand.vmem [shape: f32[56,1], index: 2, kind: input, shape index: {}]   ;;  %s454_s3 = inlined_call_operand.hbm [shape: f32[32,128], index: 3, kind: output, shape index: {}]  }
   0x1   :  { %v15_v0 = vld [vmem:[%s451_s0] sm:$0xff]  ;;  %v16_v1 = vld [vmem:[%s451_s0 + $0x8] sm:$0xff]  ;;  %v17_v2 = vld [vmem:[%s451_s0 + $0x10] sm:$0xff]  ;;  %285 = vmatprep.subr.bf16.mxu0 %v344_v3  ;;  %291 = vmatprep.subr.bf16.mxu1 %v344_v3 }
   0x2   :  { %v286_v4 = vpack.c.bf16 %v16_v1, %v15_v0  ;;  %v18_v5 = vld [vmem:[%s451_s0 + $0x18] sm:$0xff]  ;;  %264 = vmatprep.mubr.msk.f32.mxu0 %vm345_vm0, %v346_v6  ;;  %276 = vmatprep.mubr.msk.f32.mxu1 %vm345_vm0, %v346_v6  ;;  %v27_v9 = vld [vmem:[%s453_s2 + $0x8] sm:$0xff] }
   0x3   :  { %v289_v7 = vpack.c.bf16 %v18_v5, %v17_v2  ;;  %v29_v8 = vld [vmem:[%s453_s2 + $0x18] sm:$0xff]  ;;  %303 = vset.pattern.permute.xlu1 %v347_v10  ;;  %302 = vset.pattern.permute.xlu0 %v347_v10 }
   0x4   :  { %287 = vmatpush3.bf16.msra.mxu0 %v286_v4  ;;  %293 = vmatpush3.bf16.msra.mxu1 %v286_v4 }
   0x5   :  { %288 = vmatprep.subr.bf16.mxu0 %v344_v3  ;;  %292 = vmatprep.subr.bf16.mxu1 %v344_v3 }
   0x6   :  { %50 = vperm.xlu1 %303, %v29_v8   ;;  %40 = vperm.xlu0 %302, %v27_v9  }
   0x7   :  { %8 = vsyncpa [#allocation3], 0  ;;  %v19_v11 = vld [vmem:[%s452_s1] sm:$0xff]  ;;  %vm68_vm1 = vcmask 261120   ;;  %v28_v13 = vld [vmem:[%s453_s2 + $0x10] sm:$0xff] }
   0x8   :  { %290 = vmatpush3.bf16.msra.mxu0 %v289_v7  ;;  %294 = vmatpush3.bf16.msra.mxu1 %v289_v7  ;;  %v23_v12 = vld [vmem:[%s452_s1 + $0x20] sm:$0xff]  ;;  %v20_v15 = vld [vmem:[%s452_s1 + $0x8] sm:$0xff]  ;;  %v21_v19 = vld [vmem:[%s452_s1 + $0x10] sm:$0xff] }
   0x9   :  { %v26_v14 = vld [vmem:[%s453_s2] sm:$0xff]  ;;  %v24_v16 = vld [vmem:[%s452_s1 + $0x28] sm:$0xff]  ;;  %v25_v20 = vld [vmem:[%s452_s1 + $0x30] sm:$0xff] }
   0xa   :  { %45 = vperm.xlu0 %302, %v28_v13   ;;  %35 = vperm.xlu1 %303, %v26_v14   ;;  %v30_v17 = vld [vmem:[%s453_s2 + $0x20] sm:$0xff]  ;;  %v31_v18 = vld [vmem:[%s453_s2 + $0x28] sm:$0xff]  ;;  %v32_v21 = vld [vmem:[%s453_s2 + $0x30] sm:$0xff] }
   0xb   :  { %265 = vmatmul.mubr.msk.f32.vlgmr.msra.gmra.mrb[0].mxu0 %vm68_vm1, %v19_v11  ;;  %277 = vmatmul.mubr.msk.f32.vlgmr.msra.gmra.mrb[0].mxu1 %vm68_vm1, %v23_v12  ;;  %v22_v22 = vld [vmem:[%s452_s1 + $0x18] sm:$0xff]  ;;  %s348_s1 = smov [#allocation2]  }
   0xc   :  { %267 = vmatprep.mubr.msk.f32.mxu0 %vm345_vm0, %v346_v6  ;;  %279 = vmatprep.mubr.msk.f32.mxu1 %vm345_vm0, %v346_v6  ;;  %s227_s2 = sshll.u32 %s348_s1, 4  ;;  %s228_s2 = int_to_ptr.vmem [resolvable:$true] %s227_s2 }
   0xd   :  { %s320_s20 = scalar_lea.vmem %s228_s2, 512  ;;  %p325_p1 = scmp.lt.s32.totalorder %s228_s2, %s228_s2 }
   0xe   :  { %55 = vperm.xlu0 %302, %v30_v17   ;;  %60 = vperm.xlu1 %303, %v31_v18   ;;  %p321_p0 = scmp.ne.s32.totalorder %s228_s2, %s320_s20  ;;  %p326_p2 = scmp.lt.s32.totalorder %s320_s20, %s320_s20 }
   0xf   :  { %268 = vmatmul.mubr.msk.f32.gmra.mrb[2].mxu0 %vm68_vm1, %v20_v15  ;;  %280 = vmatmul.mubr.msk.f32.gmra.mrb[2].mxu1 %vm68_vm1, %v24_v16 }
  0x10   :  { %270 = vmatprep.mubr.msk.f32.mxu0 %vm345_vm0, %v346_v6  ;;  %282 = vmatprep.mubr.msk.f32.mxu1 %vm345_vm0, %v346_v6  ;;  %p327_p3 = por %p326_p2, %p325_p1 }
  0x12   :  { %65 = vperm.xlu0 %302, %v32_v21   ;;  %p328_p4 = pnand %p327_p3, %p321_p0 }
  0x13   :  { %271 = vmatmul.mubr.msk.f32.gmra.mrb[4].mxu0 %vm68_vm1, %v21_v19  ;;  %283 = vmatmul.mubr.msk.f32.gmra.mrb[4].mxu1 %vm68_vm1, %v25_v20 }
  0x14   :  { %273 = vmatprep.mubr.msk.f32.mxu0 %vm345_vm0, %v346_v6 }
  0x17   :  { %274 = vmatmul.mubr.msk.f32.gmra.mrb[6].mxu0 %vm68_vm1, %v22_v22 }
  0x85   :  { %v51_v23 = vpop.permute.xlu1 %50  ;;  %v41_v25 = vpop.permute.xlu0 %40 }
  0x89   :  { %v36_v24 = vpop.permute.xlu1 %35  ;;  %v46_v38 = vpop.permute.xlu0 %45 }
  0x8d   :  { %v56_v1 = vpop.permute.xlu0 %55  ;;  %v61_v4 = vpop.permute.xlu1 %60 }
  0x91   :  { %v66_v9 = vpop.permute.xlu0 %65 }
  0xde   :  { %v156_v26 = vpop.f32.mrb[0].mxu0  ;;  %v176_v27 = vpop.f32.mrb[0].mxu1 }
  0xdf   :  { %v157_v28 = vadd.f32 %v156_v26, %v36_v24  ;;  %v266_v29 = vpop.f32.mrb[1].mxu0  ;;  %v278_v30 = vpop.f32.mrb[1].mxu1  ;;  %v177_v2 = vadd.f32 %v176_v27, %v56_v1 }
  0xe1   :  { %v190_v31 = vsub.f32 0.0, %v157_v28  ;;  %v210_v60 = vmul.f32 1.6765325, %v157_v28 }
  0xe2   :  { %v161_v32 = vpop.f32.mrb[2].mxu0  ;;  %v181_v33 = vpop.f32.mrb[2].mxu1 }
  0xe3   :  { %v191_v34 = vmul.f32 1.442695, %v190_v31  ;;  %v162_v35 = vadd.f32 %v161_v32, %v41_v25  ;;  %v269_v36 = vpop.f32.mrb[3].mxu0  ;;  %v281_v37 = vpop.f32.mrb[3].mxu1  ;;  %v182_v7 = vadd.f32 %v181_v33, %v61_v4 }
  0xe5   :  { %304 = vpow2.f32 %v191_v34  ;;  %v195_v39 = vsub.f32 0.0, %v162_v35 }
  0xe6   :  { %v166_v40 = vpop.f32.mrb[4].mxu0  ;;  %v186_v41 = vpop.f32.mrb[4].mxu1 }
  0xe7   :  { %v198_v42 = vmul.f32 1.442695, %v195_v39  ;;  %v167_v43 = vadd.f32 %v166_v40, %v46_v38  ;;  %v272_v44 = vpop.f32.mrb[5].mxu0  ;;  %v284_v45 = vpop.f32.mrb[5].mxu1  ;;  %v187_v12 = vadd.f32 %v186_v41, %v66_v9 }
  0xe9   :  { %306 = vpow2.f32 %v198_v42  ;;  %v196_v46 = vsub.f32 0.0, %v167_v43 }
  0xea   :  { %v171_v47 = vpop.f32.mrb[6].mxu0 }
  0xeb   :  { %v200_v48 = vmul.f32 1.442695, %v196_v46  ;;  %v172_v49 = vadd.f32 %v171_v47, %v51_v23  ;;  %v275_v50 = vpop.f32.mrb[7].mxu0 }
  0xed   :  { %308 = vpow2.f32 %v200_v48  ;;  %v197_v51 = vsub.f32 0.0, %v172_v49 }
  0xef   :  { %v305_v52 = vpop.eup %304  ;;  %v202_v53 = vmul.f32 1.442695, %v197_v51 }
  0xf0   :  { %v193_v54 = vadd.f32 1.0, %v305_v52 }
  0xf1   :  { %310 = vpow2.f32 %v202_v53 }
  0xf2   :  { %312 = vrcp.f32 %v193_v54 }
  0xf3   :  { %v307_v55 = vpop.eup %306 }
  0xf4   :  { %v204_v56 = vadd.f32 1.0, %v307_v55 }
  0xf6   :  { %314 = vrcp.f32 %v204_v56 }
  0xf7   :  { %v309_v57 = vpop.eup %308 }
  0xf8   :  { %v205_v58 = vadd.f32 1.0, %v309_v57 }
  0xfa   :  { %316 = vrcp.f32 %v205_v58 }
  0xfb   :  { %v311_v59 = vpop.eup %310 }
  0xfc   :  { %v313_v61 = vpop.eup %312  ;;  %v206_v62 = vadd.f32 1.0, %v311_v59 }
  0xfd   :  { %v211_v63 = vmul.f32 %v313_v61, %v210_v60 }
  0xfe   :  { %318 = vrcp.f32 %v206_v62 }
  0xff   :  { %218 = vst [vmem:[#allocation2] sm:$0xff] %v211_v63 }
 0x100   :  { %v315_v0 = vpop.eup %314 }
 0x101   :  { %v212_v3 = vmul.f32 1.8462286, %v315_v0 }
 0x103   :  { %v215_v5 = vmul.f32 %v212_v3, %v177_v2 }
 0x104   :  { %v317_v6 = vpop.eup %316 }
 0x105   :  { %219 = vst [vmem:[#allocation2 + $0x8] sm:$0xff] %v215_v5  ;;  %v213_v8 = vmul.f32 1.8462286, %v317_v6 }
 0x107   :  { %v216_v10 = vmul.f32 %v213_v8, %v182_v7 }
 0x108   :  { %v319_v11 = vpop.eup %318 }
 0x109   :  { %220 = vst [vmem:[#allocation2 + $0x10] sm:$0xff] %v216_v10  ;;  %v214_v13 = vmul.f32 1.8462286, %v319_v11 }
 0x10b   :  { %v217_v14 = vmul.f32 %v214_v13, %v187_v12 }
 0x10d   :  { %221 = vst [vmem:[#allocation2 + $0x18] sm:$0xff] %v217_v14 }
 0x10e   :  { %331 = shalt.err (!%p328_p4)
}
 0x10f   :  { %s332_s23 = scalar_lea.hbm %s454_s3, 512 }
 0x110   :  { %p333_p5 = scmp.ne.s32.totalorder %s454_s3, %s332_s23  ;;  %p336_p6 = scmp.lt.u32.totalorder %s332_s23, %s454_s3 }
 0x112   :  { %p338_p7 = pnand %p336_p6, %p333_p5 }
 0x114   :  { %341 = shalt.err (!%p338_p7)
}
 0x115   :  { %s349_s27 = smov 128   ;;  %s350_s28 = smov 8  }
 0x116   :  { %233 = dma.vmem_to_hbm [thread:$0]  %s228_s2, 512, %s454_s3, [#allocation3], %s349_s27, %s349_s27, %s350_s28  }
 0x117   :  { %342 = dma.done.wait [#allocation3], 512  }
 0x118   :  { %343 = vsyncadd [#allocation3], 4294966784 }
 0x119   :  { %237 = vsyncpa [#allocation3], 1 }

</bundles_post_ra>
